<compile_context>
chip_gen: v7x
topology: tpu7x:2x2x1
jax: 0.10.0
libtpu: 0.0.40
codegen_flags: <defaults>
</compile_context>

<pallas_src>
import functools

import jax
import jax.numpy as jnp
from jax.experimental import pallas as pl
from jax.experimental.pallas import tpu as pltpu

_EPS = 1e-6                       # matches torch pairwise_distance default eps
_VMEM_LIMIT_BYTES = 48 << 20      # safe under v7x's 64 MiB physical VMEM / TC
_TILE_BUDGET_BYTES = 28 << 20     # inputs (2 x 2 buffers) + f32 temporaries


def _sublane(dtype):
    # native sublane packing: 8 rows for 4-byte, 16 for 2-byte, 32 for 1-byte
    return {4: 8, 2: 16, 1: 32}.get(jnp.dtype(dtype).itemsize, 8)


def _round_up(x, m):
    return ((x + m - 1) // m) * m


def _pick_tile_b(B, D, dtype):
    """Largest batch tile (native sublane multiple) fitting the VMEM budget."""
    itemsize = jnp.dtype(dtype).itemsize
    sub = _sublane(dtype)
    # per-row VMEM bytes: 2 inputs x 2 pipeline buffers at native dtype plus
    # ~2 tile-sized f32 temporaries produced in the body (diff, diff*diff),
    # plus small per-row slack (d buffers, term columns).
    per_row = D * (4 * itemsize + 2 * 4) + 64
    tb = _TILE_BUDGET_BYTES // per_row
    # keep >= 2 tiles when possible so the "parallel" leading grid axis can
    # land on both TensorCores on v7x
    half_b = _round_up(max((B + 1) // 2, sub), sub)
    tb = min(tb, half_b)
    tb = max(sub, (tb // sub) * sub)
    return int(tb)


def _contrastive_loss_kernel(y1_ref, y2_ref, d_ref, out_ref, acc_ref, *,
                             margin, batch, tiles_per_core, tile_b):
    c = pl.program_id(0)          # "parallel" axis (TensorCore on v7x)
    i = pl.program_id(1)          # "arbitrary" reduction axis within the core

    @pl.when(i == 0)
    def _():
        acc_ref[...] = jnp.zeros_like(acc_ref)

    # eps-on-the-difference matches torch.nn.functional.pairwise_distance.
    diff = y1_ref[...].astype(jnp.float32) - y2_ref[...].astype(jnp.float32) + _EPS
    sq_sum = jnp.sum(diff * diff, axis=-1, keepdims=True)        # [TB, 1]
    euc_dist = jnp.sqrt(sq_sum)                                  # [TB, 1]
    d = d_ref[...].astype(jnp.float32)                           # [TB, 1]

    pos_term = (1.0 - d) * sq_sum                                # (1-d)*dist^2
    hinge = jnp.maximum(margin - euc_dist, 0.0)
    neg_term = d * (hinge * hinge)

    # Global (un-clamped) row indices. Rows of a partial (or clamped-duplicate)
    # block can hold stale VMEM garbage (NaN/Inf), so select with where.
    tile_idx = c * tiles_per_core + i
    row = jax.lax.broadcasted_iota(jnp.int32, sq_sum.shape, 0) + tile_idx * tile_b
    terms = jnp.where(row < batch, pos_term + neg_term, 0.0)

    # scalar running sum, broadcast across the (8, 128) accumulator vreg
    acc_ref[...] += jnp.sum(terms)

    @pl.when(i == pl.num_programs(1) - 1)
    def _():
        out_ref[...] = acc_ref[...].reshape(1, 8, 128)


def supervised_contrastive_loss(y1, y2, d=0, margin=2.0, tile_b=None):
    """y1, y2: [B, D]; d: scalar or [B] / [B, 1] labels. Returns scalar f32 loss."""
    B, D = y1.shape
    itemsize = jnp.dtype(y1.dtype).itemsize
    sub = _sublane(y1.dtype)

    d_arr = jnp.asarray(d, dtype=jnp.float32)
    if d_arr.ndim == 0:
        d_arr = jnp.full((B, 1), d_arr, dtype=jnp.float32)
    else:
        d_arr = jnp.broadcast_to(d_arr.reshape(-1, 1), (B, 1)).astype(jnp.float32)

    if tile_b is None:
        tile_b = _pick_tile_b(B, D, y1.dtype)
    else:
        tile_b = max(sub, _round_up(int(tile_b), sub))

    n_tiles = pl.cdiv(B, tile_b)
    n_cores = 2 if n_tiles >= 2 else 1          # leading "parallel" axis (v7x 2 TCs)
    tiles_per_core = pl.cdiv(n_tiles, n_cores)

    def in_map(c, i):
        # clamp so a core's trailing (duplicate) step never issues an
        # out-of-bounds DMA; the in-kernel row mask (un-clamped) zeroes it out.
        t = jnp.minimum(c * tiles_per_core + i, n_tiles - 1)
        return (t, 0)

    kernel = functools.partial(
        _contrastive_loss_kernel,
        margin=float(margin),
        batch=int(B),
        tiles_per_core=int(tiles_per_core),
        tile_b=int(tile_b),
    )

    cost = pl.CostEstimate(
        flops=int(5 * B * D),
        transcendentals=int(B),
        bytes_accessed=int(2 * B * D * itemsize + 4 * B + n_cores * 8 * 128 * 4),
    )

    out = pl.pallas_call(
        kernel,
        out_shape=jax.ShapeDtypeStruct((n_cores, 8, 128), jnp.float32),
        grid=(n_cores, tiles_per_core),
        in_specs=[
            pl.BlockSpec((tile_b, D), in_map),
            pl.BlockSpec((tile_b, D), in_map),
            pl.BlockSpec((tile_b, 1), in_map),
        ],
        out_specs=pl.BlockSpec((1, 8, 128), lambda c, i: (c, 0, 0)),
        scratch_shapes=[pltpu.VMEM((8, 128), jnp.float32)],
        compiler_params=pltpu.CompilerParams(
            dimension_semantics=("parallel", "arbitrary"),
            vmem_limit_bytes=_VMEM_LIMIT_BYTES,
        ),
        cost_estimate=cost,
    )(y1, y2, d_arr)

    # combine the per-core partial sums and divide by the true batch size
    return jnp.sum(out[:, 0, 0]) * (1.0 / float(B))


def _reference_loss(y1, y2, d, margin=2.0):
    diff = y1.astype(jnp.float32) - y2.astype(jnp.float32) + _EPS
    dist = jnp.sqrt(jnp.sum(diff * diff, axis=-1))
    d = jnp.broadcast_to(jnp.asarray(d, jnp.float32), dist.shape)
    return jnp.mean((1 - d) * dist ** 2 + d * jnp.clip(margin - dist, 0.0) ** 2)


if __name__ == "__main__":
    key = jax.random.PRNGKey(0)
    k1, k2, k3, k4, k5, k6 = jax.random.split(key, 6)

    # Test 1: default d=0, single tile / single core path.
    B, D = 8, 32
    y1 = jax.random.normal(k1, (B, D), dtype=jnp.float32)
    y2 = jax.random.normal(k2, (B, D), dtype=jnp.float32)
    loss0 = supervised_contrastive_loss(y1, y2, d=0)
    jax.block_until_ready(loss0)
    ref0 = _reference_loss(y1, y2, 0.0)
    assert jnp.allclose(loss0, ref0, rtol=1e-5, atol=1e-5), (loss0, ref0)

    # Test 2: per-sample labels + ragged B (no wrapper pad; partial block mask).
    B2, D2 = 13, 32
    y1b = jax.random.normal(k3, (B2, D2), dtype=jnp.float32)
    y2b = jax.random.normal(k4, (B2, D2), dtype=jnp.float32)
    d_lbl = jax.random.bernoulli(k5, 0.5, (B2,)).astype(jnp.float32)
    loss1 = supervised_contrastive_loss(y1b, y2b, d=d_lbl)
    jax.block_until_ready(loss1)
    ref1 = _reference_loss(y1b, y2b, d_lbl)
    assert jnp.allclose(loss1, ref1, rtol=1e-5, atol=1e-5), (loss1, ref1)

    # Test 3: forced multi-tile, odd tile count -> exercises the 2-core grid
    # split, the clamped duplicate block, and the cross-step accumulator.
    B3, D3 = 40, 64
    y1c = jax.random.normal(k6, (B3, D3), dtype=jnp.float32)
    y2c = jax.random.normal(k1, (B3, D3), dtype=jnp.float32)
    d3 = jax.random.bernoulli(k2, 0.5, (B3,)).astype(jnp.float32)
    loss2 = supervised_contrastive_loss(y1c, y2c, d=d3, tile_b=16)
    jax.block_until_ready(loss2)
    ref2 = _reference_loss(y1c, y2c, d3)
    assert jnp.allclose(loss2, ref2, rtol=1e-5, atol=1e-5), (loss2, ref2)

    print("KERNEL_OK")
</pallas_src>

<mosaic_0001>
module attributes {stable_mosaic.version = 11 : i64} {
  func.func @_contrastive_loss_kernel(%arg0: i32, %arg1: i32, %arg2: memref<8x32xf32, #tpu.memory_space<vmem>>, %arg3: memref<8x32xf32, #tpu.memory_space<vmem>>, %arg4: memref<8x1xf32, #tpu.memory_space<vmem>>, %arg5: memref<1x8x128xf32, #tpu.memory_space<vmem>>, %arg6: memref<8x128xf32, #tpu.memory_space<vmem>>) attributes {dimension_semantics = [#tpu.dimension_semantics<parallel>, #tpu.dimension_semantics<arbitrary>], iteration_bounds = array<i64: 1, 1>, scalar_prefetch = 0 : i64, scratch_operands = 1 : i64, tpu.core_type = #tpu.core_type<tc>, window_params = [{transform_indices = @transform_0, window_bounds = array<i64: 8, 32>}, {transform_indices = @transform_1, window_bounds = array<i64: 8, 32>}, {transform_indices = @transform_2, window_bounds = array<i64: 8, 1>}, {transform_indices = @transform_3, window_bounds = array<i64: 1, 8, 128>}]} {
    %c0_i32 = arith.constant 0 : i32
    %0 = arith.cmpi eq, %arg1, %c0_i32 : i32
    %1 = arith.extui %0 : i1 to i32
    %c0_i32_0 = arith.constant 0 : i32
    %2 = arith.cmpi ne, %1, %c0_i32_0 : i32
    scf.if %2 {
      %cst_19 = arith.constant 0.000000e+00 : f32
      %44 = vector.broadcast %cst_19 : f32 to vector<8x128xf32>
      %c0_20 = arith.constant 0 : index
      %c0_21 = arith.constant 0 : index
      %45 = vector.load %arg6[%c0_20, %c0_21] : memref<8x128xf32, #tpu.memory_space<vmem>>, vector<8x128xf32>
      tpu.vector_store %arg6[%c0_20, %c0_21], %44 {strides = array<i32>} : memref<8x128xf32, #tpu.memory_space<vmem>>, vector<8x128xf32>,
    } else {
    }
    %c0 = arith.constant 0 : index
    %c0_1 = arith.constant 0 : index
    %3 = vector.load %arg2[%c0, %c0_1] : memref<8x32xf32, #tpu.memory_space<vmem>>, vector<8x32xf32>
    %c0_2 = arith.constant 0 : index
    %c0_3 = arith.constant 0 : index
    %4 = vector.load %arg3[%c0_2, %c0_3] : memref<8x32xf32, #tpu.memory_space<vmem>>, vector<8x32xf32>
    %5 = arith.subf %3, %4 : vector<8x32xf32>
    %cst = arith.constant 9.99999997E-7 : f32
    %6 = vector.broadcast %cst : f32 to vector<8x32xf32>
    %7 = arith.addf %5, %6 : vector<8x32xf32>
    %8 = arith.mulf %7, %7 : vector<8x32xf32>
    %cst_4 = arith.constant dense<0.000000e+00> : vector<8xf32>
    %9 = vector.multi_reduction <add>, %8, %cst_4 [1] : vector<8x32xf32> to vector<8xf32>
    %10 = vector.shape_cast %9 : vector<8xf32> to vector<8x1xf32>
    %11 = math.sqrt %10 : vector<8x1xf32>
    %c0_5 = arith.constant 0 : index
    %c0_6 = arith.constant 0 : index
    %12 = vector.load %arg4[%c0_5, %c0_6] : memref<8x1xf32, #tpu.memory_space<vmem>>, vector<8x1xf32>
    %cst_7 = arith.constant 1.000000e+00 : f32
    %13 = vector.broadcast %cst_7 : f32 to vector<8x1xf32>
    %14 = arith.subf %13, %12 : vector<8x1xf32>
    %15 = arith.mulf %14, %10 : vector<8x1xf32>
    %cst_8 = arith.constant 2.000000e+00 : f32
    %16 = vector.broadcast %cst_8 : f32 to vector<8x1xf32>
    %17 = arith.subf %16, %11 : vector<8x1xf32>
    %cst_9 = arith.constant 0.000000e+00 : f32
    %18 = vector.broadcast %cst_9 : f32 to vector<8x1xf32>
    %19 = arith.maximumf %17, %18 : vector<8x1xf32>
    %20 = arith.mulf %19, %19 : vector<8x1xf32>
    %21 = arith.mulf %12, %20 : vector<8x1xf32>
    %c1_i32 = arith.constant 1 : i32
    %22 = arith.muli %arg0, %c1_i32 : i32
    %23 = arith.addi %22, %arg1 : i32
    %24 = tpu.iota {dimensions = array<i32: 0>} : vector<8x1xi32>
    %c8_i32 = arith.constant 8 : i32
    %25 = arith.muli %23, %c8_i32 : i32
    %26 = vector.broadcast %25 : i32 to vector<8x1xi32>
    %27 = arith.addi %24, %26 : vector<8x1xi32>
    %c8_i32_10 = arith.constant 8 : i32
    %28 = vector.broadcast %c8_i32_10 : i32 to vector<8x1xi32>
    %29 = arith.cmpi slt, %27, %28 : vector<8x1xi32>
    %30 = arith.addf %15, %21 : vector<8x1xf32>
    %cst_11 = arith.constant 0.000000e+00 : f32
    %31 = vector.broadcast %cst_11 : f32 to vector<8x1xf32>
    %32 = arith.select %29, %30, %31 : vector<8x1xi1>, vector<8x1xf32>
    %c0_12 = arith.constant 0 : index
    %c0_13 = arith.constant 0 : index
    %33 = vector.load %arg6[%c0_12, %c0_13] : memref<8x128xf32, #tpu.memory_space<vmem>>, vector<8x128xf32>
    %34 = vector.shape_cast %32 : vector<8x1xf32> to vector<1x8x1xf32>
    %cst_14 = arith.constant dense<0.000000e+00> : vector<1xf32>
    %35 = vector.multi_reduction <add>, %34, %cst_14 [1, 2] : vector<1x8x1xf32> to vector<1xf32>
    %36 = vector.shape_cast %35 : vector<1xf32> to vector<1x1x1xf32>
    %37 = vector.extract %36[0, 0, 0] : f32 from vector<1x1x1xf32>
    %38 = vector.broadcast %37 : f32 to vector<8x128xf32>
    %39 = arith.addf %33, %38 : vector<8x128xf32>
    %c0_15 = arith.constant 0 : index
    %c0_16 = arith.constant 0 : index
    %40 = vector.load %arg6[%c0_15, %c0_16] : memref<8x128xf32, #tpu.memory_space<vmem>>, vector<8x128xf32>
    tpu.vector_store %arg6[%c0_15, %c0_16], %39 {strides = array<i32>} : memref<8x128xf32, #tpu.memory_space<vmem>>, vector<8x128xf32>,
    %c0_i32_17 = arith.constant 0 : i32
    %41 = arith.cmpi eq, %arg1, %c0_i32_17 : i32
    %42 = arith.extui %41 : i1 to i32
    %c0_i32_18 = arith.constant 0 : i32
    %43 = arith.cmpi ne, %42, %c0_i32_18 : i32
    scf.if %43 {
      %c0_19 = arith.constant 0 : index
      %c0_20 = arith.constant 0 : index
      %44 = vector.load %arg6[%c0_19, %c0_20] : memref<8x128xf32, #tpu.memory_space<vmem>>, vector<8x128xf32>
      %45 = vector.shape_cast %44 : vector<8x128xf32> to vector<1x8x128xf32>
      %c0_21 = arith.constant 0 : index
      %c0_22 = arith.constant 0 : index
      %c0_23 = arith.constant 0 : index
      %46 = vector.load %arg5[%c0_21, %c0_22, %c0_23] : memref<1x8x128xf32, #tpu.memory_space<vmem>>, vector<1x8x128xf32>
      tpu.vector_store %arg5[%c0_21, %c0_22, %c0_23], %45 {strides = array<i32>} : memref<1x8x128xf32, #tpu.memory_space<vmem>>, vector<1x8x128xf32>,
    } else {
    }
    return
  }
  func.func @transform_0(%arg0: i32, %arg1: i32) -> (i32, i32) {
    %c1_i32 = arith.constant 1 : i32
    %0 = arith.muli %arg0, %c1_i32 : i32
    %1 = arith.addi %0, %arg1 : i32
    %c0_i32 = arith.constant 0 : i32
    %2 = arith.minsi %1, %c0_i32 : i32
    %c0_i32_0 = arith.constant 0 : i32
    %c0_i32_1 = arith.constant 0 : i32
    return %2, %c0_i32_0 : i32, i32
  }
  func.func @transform_1(%arg0: i32, %arg1: i32) -> (i32, i32) {
    %c1_i32 = arith.constant 1 : i32
    %0 = arith.muli %arg0, %c1_i32 : i32
    %1 = arith.addi %0, %arg1 : i32
    %c0_i32 = arith.constant 0 : i32
    %2 = arith.minsi %1, %c0_i32 : i32
    %c0_i32_0 = arith.constant 0 : i32
    %c0_i32_1 = arith.constant 0 : i32
    return %2, %c0_i32_0 : i32, i32
  }
  func.func @transform_2(%arg0: i32, %arg1: i32) -> (i32, i32) {
    %c1_i32 = arith.constant 1 : i32
    %0 = arith.muli %arg0, %c1_i32 : i32
    %1 = arith.addi %0, %arg1 : i32
    %c0_i32 = arith.constant 0 : i32
    %2 = arith.minsi %1, %c0_i32 : i32
    %c0_i32_0 = arith.constant 0 : i32
    %c0_i32_1 = arith.constant 0 : i32
    return %2, %c0_i32_0 : i32, i32
  }
  func.func @transform_3(%arg0: i32, %arg1: i32) -> (i32, i32, i32) {
    %c0_i32 = arith.constant 0 : i32
    %c0_i32_0 = arith.constant 0 : i32
    %c0_i32_1 = arith.constant 0 : i32
    return %arg0, %c0_i32, %c0_i32_0 : i32, i32, i32
  }
}

</mosaic_0001>

<bundles_post_ra>
// kernel: tpu_custom_call.1
= control target key start
LH: loop header
LB: loop body
LE: loop exit
PB: predicated region body
PF: predicated region fallthrough
CT: control target
= control target key end

     0   :  { %8 = vsyncpa [#allocation4], 0  ;;  %s281_s0 = inlined_call_operand.vmem [shape: f32[8,32], index: 0, kind: input, shape index: {}]   ;;  %s282_s1 = inlined_call_operand.hbm [shape: f32[8,32], index: 1, kind: input, shape index: {}]   ;;  %s283_s2 = inlined_call_operand.vmem [shape: f32[8,1], index: 2, kind: input, shape index: {}]   ;;  %s284_s3 = inlined_call_operand.hbm [shape: f32[1,8,128], index: 3, kind: output, shape index: {}]  }
   0x1   :  { %9 = vsyncpa [#allocation5], 0  ;;  %s229_s12 = smov [#allocation3]   ;;  %s181_s16 = scalar_lea.hbm %s282_s1, 128 }
   0x2   :  { %s33_s13 = sshll.u32 %s229_s12, 4  ;;  %p182_p0 = scmp.ne.s32.totalorder %s282_s1, %s181_s16  ;;  %s34_s13 = int_to_ptr.vmem [resolvable:$true] %s33_s13 }
   0x3   :  { %p185_p1 = scmp.lt.u32.totalorder %s181_s16, %s282_s1 }
   0x5   :  { %p187_p2 = pnand %p185_p1, %p182_p0 }
   0x7   :  { %190 = shalt.err (!%p187_p2)
}
   0x8   :  { %s191_s21 = scalar_lea.vmem %s34_s13, 128  ;;  %p196_p4 = scmp.lt.s32.totalorder %s34_s13, %s34_s13 }
   0x9   :  { %p192_p3 = scmp.ne.s32.totalorder %s34_s13, %s191_s21  ;;  %p197_p5 = scmp.lt.s32.totalorder %s191_s21, %s191_s21 }
   0xb   :  { %p198_p6 = por %p197_p5, %p196_p4 }
   0xd   :  { %p199_p7 = pnand %p198_p6, %p192_p3 }
   0xf   :  { %202 = shalt.err (!%p199_p7)
}
  0x10   :  { %36 = dma.hbm_to_vmem [thread:$0]  %s282_s1, 128, %s34_s13, [#allocation4]  }
  0x11   :  { %225 = dma.done.wait [#allocation4], 128  }
  0x12   :  { %226 = vsyncadd [#allocation4], 4294967168  ;;  %v94_v0 = vld [vmem:[%s281_s0] sm:$0xff]  ;;  %vm99_vm0 = vcmask 261120   ;;  %vm127_vm3 = vcmask 7168   ;;  %s230_s0 = smov [#allocation6]  }
  0x13   :  { %v95_v1 = vld [vmem:[#allocation3] sm:$0xff] }
  0x14   :  { %v96_v2 = vsub.f32 %v94_v0, %v95_v1  ;;  %v110_v12 = vld [vmem:[%s283_s2] sm:$0xff]  ;;  %s152_s2 = sshll.u32 %s230_s0, 4  ;;  %s153_s2 = int_to_ptr.vmem [resolvable:$true] %s152_s2 }
  0x15   :  { %v111_v14 = vsub.f32 1.0, %v110_v12  ;;  %s203_s28 = scalar_lea.vmem %s153_s2, 128  ;;  %p208_p9 = scmp.lt.s32.totalorder %s153_s2, %s153_s2 }
  0x16   :  { %v97_v3 = vadd.f32 1e-06, %v96_v2  ;;  %p204_p8 = scmp.ne.s32.totalorder %s153_s2, %s203_s28  ;;  %p209_p10 = scmp.lt.s32.totalorder %s203_s28, %s203_s28 }
  0x18   :  { %v98_v4 = vmul.f32 %v97_v3, %v97_v3  ;;  %p210_p11 = por %p209_p10, %p208_p9 }
  0x1a   :  { %v100_v5 = vsel %vm99_vm0, %v98_v4, 0.0  ;;  %p211_p12 = pnand %p210_p11, %p204_p8 }
  0x1b   :  { %101 = vadd.xlane.f32.xlu0 %v100_v5 }
  0xa8   :  { %v102_v6 = vpop.xlane.xlu0 %101 }
  0xa9   :  { %179 = vrsqrt.f32 %v102_v6  ;;  %vm105_vm1 = vcmp.eq.f32.partialorder %v102_v6, inf  ;;  %v108_v9 = vand.u32 2147483648, %v102_v6  ;;  %vm107_vm2 = vcmp.eq.f32.partialorder %v102_v6, 0.0 }
  0xaa   :  { %v112_v17 = vmul.f32 %v111_v14, %v102_v6 }
  0xb3   :  { %v180_v7 = vpop.eup %179 }
  0xb4   :  { %v104_v8 = vmul.f32 %v180_v7, %v102_v6 }
  0xb6   :  { %v106_v10 = vsel %vm105_vm1, %v102_v6, %v104_v8 }
  0xb7   :  { %v109_v11 = vsel %vm107_vm2, %v108_v9, %v106_v10 }
  0xb8   :  { %v113_v13 = vsub.f32 2.0, %v109_v11 }
  0xba   :  { %v114_v15 = vmax.f32 %v113_v13, 0.0 }
  0xbc   :  { %v115_v16 = vmul.f32 %v114_v15, %v114_v15 }
  0xbe   :  { %v116_v18 = vmul.f32 %v115_v16, %v110_v12 }
  0xc0   :  { %v124_v19 = vadd.f32 %v116_v18, %v112_v17 }
  0xc2   :  { %v128_v20 = vsel %vm127_vm3, %v124_v19, 0.0 }
  0xc3   :  { %129 = vadd.xlane.f32.xlu0 %v128_v20 }
 0x150   :  { %v130_v21 = vpop.xlane.xlu0 %129 }
 0x151   :  { %v131_v22 = vrot.slane %v130_v21, 4 }
 0x153   :  { %v132_v23 = vadd.f32 %v131_v22, %v130_v21 }
 0x155   :  { %v133_v24 = vrot.slane %v132_v23, 2 }
 0x157   :  { %v134_v25 = vadd.f32 %v133_v24, %v132_v23 }
 0x159   :  { %v135_v26 = vrot.slane %v134_v25, 1 }
 0x15b   :  { %v136_v27 = vadd.f32 %v135_v26, %v134_v25 }
 0x15d   :  { %175 = vpush %v136_v27 }
 0x18e   :  { %s176_s27 = spop %175 }
 0x18f   :  { %v138_v28 = vstv %s176_s27 }
 0x190   :  { %145 = vst [vmem:[#allocation6] sm:$0xff] %v138_v28 }
 0x191   :  { %214 = shalt.err (!%p211_p12)
}
 0x192   :  { %s215_s4 = scalar_lea.hbm %s284_s3, 128 }
 0x193   :  { %p216_p13 = scmp.ne.s32.totalorder %s284_s3, %s215_s4  ;;  %p219_p0 = scmp.lt.u32.totalorder %s215_s4, %s284_s3 }
 0x195   :  { %p221_p1 = pnand %p219_p0, %p216_p13 }
 0x197   :  { %224 = shalt.err (!%p221_p1)
}
 0x198   :  { %155 = dma.vmem_to_hbm [thread:$0]  %s153_s2, 128, %s284_s3, [#allocation5]  }
 0x199   :  { %227 = dma.done.wait [#allocation5], 128  }
 0x19a   :  { %228 = vsyncadd [#allocation5], 4294967168 }
 0x19b   :  { %159 = vsyncpa [#allocation4], 1 }
 0x19c   :  { %160 = vsyncpa [#allocation5], 1 }

</bundles_post_ra>
